<compile_context>
chip_gen: v7x
topology: tpu7x:2x2x1
jax: 0.10.0
libtpu: 0.0.40
codegen_flags: <defaults>
</compile_context>

<pallas_src>
import functools

import jax
import jax.numpy as jnp
from jax import lax
from jax.experimental import pallas as pl
from jax.experimental.pallas import tpu as pltpu

_LANE = 128
_ACC_ROWS = 8          # f32 accumulator is one vreg: (8, 128)
_CHUNK_ROWS = 128      # in-kernel sub-chunk (bounds live temporaries)
_SMALL_FALLBACK_ELEMS = 32768


def _sublane_pack(dtype):
    """Rows per vreg tile for this dtype: 8 (f32), 16 (bf16), 32 (int8/fp8)."""
    return max(8, 32 // jnp.dtype(dtype).itemsize)


def _tpu_generation_defaults():
    """(num_shards, per-input tile bytes) chosen per TPU generation."""
    shards, tile_bytes = 1, 2 << 20                 # conservative default
    try:
        kind = jax.devices()[0].device_kind.lower().replace(" ", "")
        if ("v7" in kind) or ("tpu7" in kind):
            shards, tile_bytes = 2, 4 << 20          # 2 TCs, 3.2 TB/s each
        elif "v6" in kind:
            shards, tile_bytes = 1, 4 << 20          # 1 TC, 32 MiB scoped VMEM
        elif ("v5" in kind) or ("v4" in kind):
            shards, tile_bytes = 1, 2 << 20          # 16 MiB default scoped VMEM
    except Exception:
        pass
    return shards, tile_bytes


def _rmse_partial_kernel(yhat_ref, y_ref, out_ref, *, tile_rows, chunk_rows):
    """Accumulate per-shard sum of squared differences at vreg shape (8,128)."""
    k = pl.program_id(1)

    @pl.when(k == 0)
    def _():
        out_ref[...] = jnp.zeros_like(out_ref)

    def ssq(off, nrows):
        a = yhat_ref[pl.ds(off, nrows), :].astype(jnp.float32)
        b = y_ref[pl.ds(off, nrows), :].astype(jnp.float32)
        d = a - b
        # Reduce only the leading (row) axis with elementwise VPU adds; the
        # accumulator stays at (8, 128) -- no per-step cross-lane/XLU work.
        return jnp.sum((d * d).reshape(-1, _ACC_ROWS, _LANE), axis=0)

    n_chunks, rem_rows = divmod(tile_rows, chunk_rows)

    acc = jnp.zeros((_ACC_ROWS, _LANE), jnp.float32)
    if n_chunks > 0:
        def body(c, carry):
            off = pl.multiple_of(c * chunk_rows, chunk_rows)
            return carry + ssq(off, chunk_rows)

        acc = lax.fori_loop(0, n_chunks, body, acc, unroll=min(8, n_chunks))
    if rem_rows:
        acc = acc + ssq(n_chunks * chunk_rows, rem_rows)

    out_ref[...] += acc


def rmse_loss(yhat, y, eps=1e-6):
    """RMSE loss matching PyTorch RMSELoss: sqrt(mean((yhat - y)**2) + eps)."""
    assert yhat.shape == y.shape, "yhat and y must have the same shape"
    total = int(yhat.size)
    assert total > 0
    eps32 = jnp.float32(eps)

    def _jax_ref(a, b):
        d = a.astype(jnp.float32) - b.astype(jnp.float32)
        return jnp.sqrt(jnp.mean(d * d) + eps32)

    # Fast path: tiny tensors -- fixed pallas_call/grid overhead dominates and
    # the XLA fusion is already optimal at that scale.
    if total < _SMALL_FALLBACK_ELEMS:
        return _jax_ref(yhat, y)

    pack = max(_sublane_pack(yhat.dtype), _sublane_pack(y.dtype))
    itemsize = max(jnp.dtype(yhat.dtype).itemsize, jnp.dtype(y.dtype).itemsize)
    num_shards, tile_bytes = _tpu_generation_defaults()
    max_tile_rows = max(pack, (tile_bytes // (_LANE * itemsize)) // pack * pack)

    # ---- lane-dense (rows, 128) view of the flat data ----------------------
    yhat_flat = yhat.reshape(-1)
    y_flat = y.reshape(-1)
    tail_pad = (-total) % _LANE
    if tail_pad:
        # Ragged (non-multiple-of-128) sizes: a lane-dense view needs one O(N)
        # relayout; pad only the <128-element shortfall (zeros are inert in the
        # sum of squares; we divide by the true element count).  Aligned sizes
        # below are zero-copy.
        yhat_flat = jnp.pad(yhat_flat, (0, tail_pad))
        y_flat = jnp.pad(y_flat, (0, tail_pad))
    full_rows = (total + tail_pad) // _LANE
    yh2 = yhat_flat.reshape(full_rows, _LANE)      # free reshape when aligned
    y2 = y_flat.reshape(full_rows, _LANE)

    # ---- balanced, floor-based tiling (grid covers exactly R <= full_rows) --
    if num_shards > 1 and full_rows < 4 * num_shards * pack:
        num_shards = 1
    rows_per_shard = full_rows // num_shards
    steps = max(1, -(-rows_per_shard // max_tile_rows))          # cdiv
    tile_rows = (rows_per_shard // steps) // pack * pack
    if tile_rows == 0:
        return _jax_ref(yhat, y)
    covered_rows = num_shards * steps * tile_rows                 # <= full_rows
    chunk_rows = min(_CHUNK_ROWS, tile_rows)

    in_block_bytes = tile_rows * _LANE * (
        jnp.dtype(yhat.dtype).itemsize + jnp.dtype(y.dtype).itemsize)
    vmem_limit = int(min(40 << 20, max(24 << 20, 4 * in_block_bytes + (8 << 20))))

    cost = pl.CostEstimate(
        flops=3 * total,
        transcendentals=0,
        bytes_accessed=total * (jnp.dtype(yhat.dtype).itemsize
                                + jnp.dtype(y.dtype).itemsize)
        + num_shards * _ACC_ROWS * _LANE * 4,
    )

    grid_spec = pltpu.PrefetchScalarGridSpec(
        num_scalar_prefetch=0,
        grid=(num_shards, steps),
        in_specs=[
            pl.BlockSpec((tile_rows, _LANE), lambda p, k: (p * steps + k, 0)),
            pl.BlockSpec((tile_rows, _LANE), lambda p, k: (p * steps + k, 0)),
        ],
        out_specs=pl.BlockSpec((_ACC_ROWS, _LANE), lambda p, k: (p, 0)),
    )

    partial = pl.pallas_call(
        functools.partial(_rmse_partial_kernel,
                          tile_rows=tile_rows, chunk_rows=chunk_rows),
        out_shape=jax.ShapeDtypeStruct((num_shards * _ACC_ROWS, _LANE),
                                       jnp.float32),
        grid_spec=grid_spec,
        compiler_params=pltpu.CompilerParams(
            dimension_semantics=("parallel", "arbitrary"),
            vmem_limit_bytes=vmem_limit,
        ),
        cost_estimate=cost,
    )(yh2, y2)

    total_ss = jnp.sum(partial, dtype=jnp.float32)

    leftover_rows = full_rows - covered_rows
    if leftover_rows:
        # Small suffix not covered by the grid (< num_shards*steps*pack rows):
        # cheap XLA reduction that only reads those bytes.
        da = (yh2[covered_rows:].astype(jnp.float32)
              - y2[covered_rows:].astype(jnp.float32))
        total_ss = total_ss + jnp.sum(da * da, dtype=jnp.float32)

    return jnp.sqrt(total_ss / jnp.float32(total) + eps32)


if __name__ == "__main__":
    key = jax.random.PRNGKey(0)
    ks = jax.random.split(key, 8)

    def ref_rmse(a, b, eps=1e-6):
        d = a.astype(jnp.float32) - b.astype(jnp.float32)
        return jnp.sqrt(jnp.mean(d * d) + eps)

    # 1) Small NCHW input (batch=2, channels=4, spatial=16x16): wrapper fast path.
    a = jax.random.normal(ks[0], (2, 4, 16, 16), jnp.float32)
    b = jax.random.normal(ks[1], (2, 4, 16, 16), jnp.float32)
    out = rmse_loss(a, b)
    jax.block_until_ready(out)
    assert jnp.allclose(out, ref_rmse(a, b), rtol=1e-5, atol=1e-6), (out, ref_rmse(a, b))

    # 2) Lane-aligned size: zero-copy Pallas path.
    a = jax.random.normal(ks[2], (2, 4, 128, 128), jnp.float32)
    b = jax.random.normal(ks[3], (2, 4, 128, 128), jnp.float32)
    out = rmse_loss(a, b)
    jax.block_until_ready(out)
    assert jnp.allclose(out, ref_rmse(a, b), rtol=1e-5, atol=1e-6), (out, ref_rmse(a, b))

    # 3) Ragged (non-128-multiple) size: minimal-pad path + leftover-row suffix.
    a = jax.random.normal(ks[4], (3, 5, 77, 129), jnp.float32)
    b = jax.random.normal(ks[5], (3, 5, 77, 129), jnp.float32)
    out = rmse_loss(a, b)
    jax.block_until_ready(out)
    assert jnp.allclose(out, ref_rmse(a, b), rtol=1e-5, atol=1e-6), (out, ref_rmse(a, b))

    # 4) bf16 inputs exercise the dtype-dependent sublane packing.
    a = jax.random.normal(ks[6], (4, 8, 64, 64), jnp.bfloat16)
    b = jax.random.normal(ks[7], (4, 8, 64, 64), jnp.bfloat16)
    out = rmse_loss(a, b)
    jax.block_until_ready(out)
    assert jnp.allclose(out, ref_rmse(a, b), rtol=2e-3, atol=1e-3), (out, ref_rmse(a, b))

    print("KERNEL_OK")
</pallas_src>

<mosaic_0001>
module attributes {stable_mosaic.version = 11 : i64} {
  func.func @_rmse_partial_kernel(%arg0: i32, %arg1: i32, %arg2: memref<1024x128xf32, #tpu.memory_space<vmem>>, %arg3: memref<1024x128xf32, #tpu.memory_space<vmem>>, %arg4: memref<8x128xf32, #tpu.memory_space<vmem>>) attributes {dimension_semantics = [#tpu.dimension_semantics<parallel>, #tpu.dimension_semantics<arbitrary>], iteration_bounds = array<i64: 1, 1>, scalar_prefetch = 0 : i64, scratch_operands = 0 : i64, tpu.core_type = #tpu.core_type<tc>, window_params = [{transform_indices = @transform_0, window_bounds = array<i64: 1024, 128>}, {transform_indices = @transform_1, window_bounds = array<i64: 1024, 128>}, {transform_indices = @transform_2, window_bounds = array<i64: 8, 128>}]} {
    %c0_i32 = arith.constant 0 : i32
    %0 = arith.cmpi eq, %arg1, %c0_i32 : i32
    %1 = arith.extui %0 : i1 to i32
    %c0_i32_0 = arith.constant 0 : i32
    %2 = arith.cmpi ne, %1, %c0_i32_0 : i32
    scf.if %2 {
      %cst_36 = arith.constant 0.000000e+00 : f32
      %95 = vector.broadcast %cst_36 : f32 to vector<8x128xf32>
      %c0_37 = arith.constant 0 : index
      %c0_38 = arith.constant 0 : index
      %96 = vector.load %arg4[%c0_37, %c0_38] : memref<8x128xf32, #tpu.memory_space<vmem>>, vector<8x128xf32>
      tpu.vector_store %arg4[%c0_37, %c0_38], %95 {strides = array<i32>} : memref<8x128xf32, #tpu.memory_space<vmem>>, vector<8x128xf32>,
    } else {
    }
    %cst = arith.constant 0.000000e+00 : f32
    %3 = vector.broadcast %cst : f32 to vector<8x128xf32>
    %c0_i32_1 = arith.constant 0 : i32
    %c128_i32 = arith.constant 128 : i32
    %4 = arith.muli %c0_i32_1, %c128_i32 : i32
    %5 = tpu.assume_multiple %4, 128 : i32
    %6 = arith.index_cast %5 : i32 to index
    %c0 = arith.constant 0 : index
    %7 = vector.load %arg2[%6, %c0] : memref<1024x128xf32, #tpu.memory_space<vmem>>, vector<128x128xf32>
    %8 = arith.index_cast %5 : i32 to index
    %c0_2 = arith.constant 0 : index
    %9 = vector.load %arg3[%8, %c0_2] : memref<1024x128xf32, #tpu.memory_space<vmem>>, vector<128x128xf32>
    %10 = arith.subf %7, %9 : vector<128x128xf32>
    %11 = arith.mulf %10, %10 : vector<128x128xf32>
    %12 = vector.shape_cast %11 : vector<128x128xf32> to vector<16x8x128xf32>
    %cst_3 = arith.constant dense<0.000000e+00> : vector<8x128xf32>
    %13 = vector.multi_reduction <add>, %12, %cst_3 [0] : vector<16x8x128xf32> to vector<8x128xf32>
    %14 = arith.addf %3, %13 : vector<8x128xf32>
    %c1_i32 = arith.constant 1 : i32
    %c128_i32_4 = arith.constant 128 : i32
    %15 = arith.muli %c1_i32, %c128_i32_4 : i32
    %16 = tpu.assume_multiple %15, 128 : i32
    %17 = arith.index_cast %16 : i32 to index
    %c0_5 = arith.constant 0 : index
    %18 = vector.load %arg2[%17, %c0_5] : memref<1024x128xf32, #tpu.memory_space<vmem>>, vector<128x128xf32>
    %19 = arith.index_cast %16 : i32 to index
    %c0_6 = arith.constant 0 : index
    %20 = vector.load %arg3[%19, %c0_6] : memref<1024x128xf32, #tpu.memory_space<vmem>>, vector<128x128xf32>
    %21 = arith.subf %18, %20 : vector<128x128xf32>
    %22 = arith.mulf %21, %21 : vector<128x128xf32>
    %23 = vector.shape_cast %22 : vector<128x128xf32> to vector<16x8x128xf32>
    %cst_7 = arith.constant dense<0.000000e+00> : vector<8x128xf32>
    %24 = vector.multi_reduction <add>, %23, %cst_7 [0] : vector<16x8x128xf32> to vector<8x128xf32>
    %25 = arith.addf %14, %24 : vector<8x128xf32>
    %c2_i32 = arith.constant 2 : i32
    %c128_i32_8 = arith.constant 128 : i32
    %26 = arith.muli %c2_i32, %c128_i32_8 : i32
    %27 = tpu.assume_multiple %26, 128 : i32
    %28 = arith.index_cast %27 : i32 to index
    %c0_9 = arith.constant 0 : index
    %29 = vector.load %arg2[%28, %c0_9] : memref<1024x128xf32, #tpu.memory_space<vmem>>, vector<128x128xf32>
    %30 = arith.index_cast %27 : i32 to index
    %c0_10 = arith.constant 0 : index
    %31 = vector.load %arg3[%30, %c0_10] : memref<1024x128xf32, #tpu.memory_space<vmem>>, vector<128x128xf32>
    %32 = arith.subf %29, %31 : vector<128x128xf32>
    %33 = arith.mulf %32, %32 : vector<128x128xf32>
    %34 = vector.shape_cast %33 : vector<128x128xf32> to vector<16x8x128xf32>
    %cst_11 = arith.constant dense<0.000000e+00> : vector<8x128xf32>
    %35 = vector.multi_reduction <add>, %34, %cst_11 [0] : vector<16x8x128xf32> to vector<8x128xf32>
    %36 = arith.addf %25, %35 : vector<8x128xf32>
    %c3_i32 = arith.constant 3 : i32
    %c128_i32_12 = arith.constant 128 : i32
    %37 = arith.muli %c3_i32, %c128_i32_12 : i32
    %38 = tpu.assume_multiple %37, 128 : i32
    %39 = arith.index_cast %38 : i32 to index
    %c0_13 = arith.constant 0 : index
    %40 = vector.load %arg2[%39, %c0_13] : memref<1024x128xf32, #tpu.memory_space<vmem>>, vector<128x128xf32>
    %41 = arith.index_cast %38 : i32 to index
    %c0_14 = arith.constant 0 : index
    %42 = vector.load %arg3[%41, %c0_14] : memref<1024x128xf32, #tpu.memory_space<vmem>>, vector<128x128xf32>
    %43 = arith.subf %40, %42 : vector<128x128xf32>
    %44 = arith.mulf %43, %43 : vector<128x128xf32>
    %45 = vector.shape_cast %44 : vector<128x128xf32> to vector<16x8x128xf32>
    %cst_15 = arith.constant dense<0.000000e+00> : vector<8x128xf32>
    %46 = vector.multi_reduction <add>, %45, %cst_15 [0] : vector<16x8x128xf32> to vector<8x128xf32>
    %47 = arith.addf %36, %46 : vector<8x128xf32>
    %c4_i32 = arith.constant 4 : i32
    %c128_i32_16 = arith.constant 128 : i32
    %48 = arith.muli %c4_i32, %c128_i32_16 : i32
    %49 = tpu.assume_multiple %48, 128 : i32
    %50 = arith.index_cast %49 : i32 to index
    %c0_17 = arith.constant 0 : index
    %51 = vector.load %arg2[%50, %c0_17] : memref<1024x128xf32, #tpu.memory_space<vmem>>, vector<128x128xf32>
    %52 = arith.index_cast %49 : i32 to index
    %c0_18 = arith.constant 0 : index
    %53 = vector.load %arg3[%52, %c0_18] : memref<1024x128xf32, #tpu.memory_space<vmem>>, vector<128x128xf32>
    %54 = arith.subf %51, %53 : vector<128x128xf32>
    %55 = arith.mulf %54, %54 : vector<128x128xf32>
    %56 = vector.shape_cast %55 : vector<128x128xf32> to vector<16x8x128xf32>
    %cst_19 = arith.constant dense<0.000000e+00> : vector<8x128xf32>
    %57 = vector.multi_reduction <add>, %56, %cst_19 [0] : vector<16x8x128xf32> to vector<8x128xf32>
    %58 = arith.addf %47, %57 : vector<8x128xf32>
    %c5_i32 = arith.constant 5 : i32
    %c128_i32_20 = arith.constant 128 : i32
    %59 = arith.muli %c5_i32, %c128_i32_20 : i32
    %60 = tpu.assume_multiple %59, 128 : i32
    %61 = arith.index_cast %60 : i32 to index
    %c0_21 = arith.constant 0 : index
    %62 = vector.load %arg2[%61, %c0_21] : memref<1024x128xf32, #tpu.memory_space<vmem>>, vector<128x128xf32>
    %63 = arith.index_cast %60 : i32 to index
    %c0_22 = arith.constant 0 : index
    %64 = vector.load %arg3[%63, %c0_22] : memref<1024x128xf32, #tpu.memory_space<vmem>>, vector<128x128xf32>
    %65 = arith.subf %62, %64 : vector<128x128xf32>
    %66 = arith.mulf %65, %65 : vector<128x128xf32>
    %67 = vector.shape_cast %66 : vector<128x128xf32> to vector<16x8x128xf32>
    %cst_23 = arith.constant dense<0.000000e+00> : vector<8x128xf32>
    %68 = vector.multi_reduction <add>, %67, %cst_23 [0] : vector<16x8x128xf32> to vector<8x128xf32>
    %69 = arith.addf %58, %68 : vector<8x128xf32>
    %c6_i32 = arith.constant 6 : i32
    %c128_i32_24 = arith.constant 128 : i32
    %70 = arith.muli %c6_i32, %c128_i32_24 : i32
    %71 = tpu.assume_multiple %70, 128 : i32
    %72 = arith.index_cast %71 : i32 to index
    %c0_25 = arith.constant 0 : index
    %73 = vector.load %arg2[%72, %c0_25] : memref<1024x128xf32, #tpu.memory_space<vmem>>, vector<128x128xf32>
    %74 = arith.index_cast %71 : i32 to index
    %c0_26 = arith.constant 0 : index
    %75 = vector.load %arg3[%74, %c0_26] : memref<1024x128xf32, #tpu.memory_space<vmem>>, vector<128x128xf32>
    %76 = arith.subf %73, %75 : vector<128x128xf32>
    %77 = arith.mulf %76, %76 : vector<128x128xf32>
    %78 = vector.shape_cast %77 : vector<128x128xf32> to vector<16x8x128xf32>
    %cst_27 = arith.constant dense<0.000000e+00> : vector<8x128xf32>
    %79 = vector.multi_reduction <add>, %78, %cst_27 [0] : vector<16x8x128xf32> to vector<8x128xf32>
    %80 = arith.addf %69, %79 : vector<8x128xf32>
    %c7_i32 = arith.constant 7 : i32
    %c128_i32_28 = arith.constant 128 : i32
    %81 = arith.muli %c7_i32, %c128_i32_28 : i32
    %82 = tpu.assume_multiple %81, 128 : i32
    %83 = arith.index_cast %82 : i32 to index
    %c0_29 = arith.constant 0 : index
    %84 = vector.load %arg2[%83, %c0_29] : memref<1024x128xf32, #tpu.memory_space<vmem>>, vector<128x128xf32>
    %85 = arith.index_cast %82 : i32 to index
    %c0_30 = arith.constant 0 : index
    %86 = vector.load %arg3[%85, %c0_30] : memref<1024x128xf32, #tpu.memory_space<vmem>>, vector<128x128xf32>
    %87 = arith.subf %84, %86 : vector<128x128xf32>
    %88 = arith.mulf %87, %87 : vector<128x128xf32>
    %89 = vector.shape_cast %88 : vector<128x128xf32> to vector<16x8x128xf32>
    %cst_31 = arith.constant dense<0.000000e+00> : vector<8x128xf32>
    %90 = vector.multi_reduction <add>, %89, %cst_31 [0] : vector<16x8x128xf32> to vector<8x128xf32>
    %91 = arith.addf %80, %90 : vector<8x128xf32>
    %c8_i32 = arith.constant 8 : i32
    %c0_32 = arith.constant 0 : index
    %c0_33 = arith.constant 0 : index
    %92 = vector.load %arg4[%c0_32, %c0_33] : memref<8x128xf32, #tpu.memory_space<vmem>>, vector<8x128xf32>
    %93 = arith.addf %92, %91 : vector<8x128xf32>
    %c0_34 = arith.constant 0 : index
    %c0_35 = arith.constant 0 : index
    %94 = vector.load %arg4[%c0_34, %c0_35] : memref<8x128xf32, #tpu.memory_space<vmem>>, vector<8x128xf32>
    tpu.vector_store %arg4[%c0_34, %c0_35], %93 {strides = array<i32>} : memref<8x128xf32, #tpu.memory_space<vmem>>, vector<8x128xf32>,
    return
  }
  func.func @transform_0(%arg0: i32, %arg1: i32) -> (i32, i32) {
    %c1_i32 = arith.constant 1 : i32
    %0 = arith.muli %arg0, %c1_i32 : i32
    %1 = arith.addi %0, %arg1 : i32
    %c0_i32 = arith.constant 0 : i32
    %c0_i32_0 = arith.constant 0 : i32
    return %1, %c0_i32 : i32, i32
  }
  func.func @transform_1(%arg0: i32, %arg1: i32) -> (i32, i32) {
    %c1_i32 = arith.constant 1 : i32
    %0 = arith.muli %arg0, %c1_i32 : i32
    %1 = arith.addi %0, %arg1 : i32
    %c0_i32 = arith.constant 0 : i32
    %c0_i32_0 = arith.constant 0 : i32
    return %1, %c0_i32 : i32, i32
  }
  func.func @transform_2(%arg0: i32, %arg1: i32) -> (i32, i32) {
    %c0_i32 = arith.constant 0 : i32
    %c0_i32_0 = arith.constant 0 : i32
    return %arg0, %c0_i32 : i32, i32
  }
}

</mosaic_0001>

<bundles_post_ra>
// kernel: tpu_custom_call.1
= control target key start
LH: loop header
LB: loop body
LE: loop exit
PB: predicated region body
PF: predicated region fallthrough
CT: control target
= control target key end

     0   :  { %7 = vsyncpa [#allocation3], 0  ;;  %s960_s0 = inlined_call_operand.hbm [shape: f32[1024,128], index: 0, kind: input, shape index: {}]   ;;  %s961_s1 = inlined_call_operand.hbm [shape: f32[1024,128], index: 1, kind: input, shape index: {}]   ;;  %s962_s2 = inlined_call_operand.hbm [shape: f32[8,128], index: 2, kind: output, shape index: {}]  }
   0x1   :  { %8 = vsyncpa [#allocation6], 0 }
   0x2   :  { %9 = vsyncpa [#allocation4], 0  ;;  %s808_s9 = smov [#allocation2]   ;;  %s736_s13 = scalar_lea.hbm %s960_s0, 16384 }
   0x3   :  { %s19_s10 = sshll.u32 %s808_s9, 4  ;;  %p737_p0 = scmp.ne.s32.totalorder %s960_s0, %s736_s13  ;;  %s20_s10 = int_to_ptr.vmem [resolvable:$true] %s19_s10 }
   0x4   :  { %p740_p1 = scmp.lt.u32.totalorder %s736_s13, %s960_s0 }
   0x6   :  { %p742_p2 = pnand %p740_p1, %p737_p0 }
   0x8   :  { %745 = shalt.err (!%p742_p2)
}
   0x9   :  { %s746_s18 = scalar_lea.vmem %s20_s10, 16384  ;;  %p751_p4 = scmp.lt.s32.totalorder %s20_s10, %s20_s10 }
   0xa   :  { %p747_p3 = scmp.ne.s32.totalorder %s20_s10, %s746_s18  ;;  %p752_p5 = scmp.lt.s32.totalorder %s746_s18, %s746_s18 }
   0xc   :  { %p753_p6 = por %p752_p5, %p751_p4 }
   0xe   :  { %p754_p7 = pnand %p753_p6, %p747_p3 }
  0x10   :  { %757 = shalt.err (!%p754_p7)
}
  0x11   :  { %s809_s19 = smov 128   ;;  %s810_s20 = smov 8  }
  0x12   :  { %25 = dma.hbm_to_vmem [thread:$0]  %s960_s0, 16384, %s20_s10, [#allocation3], %s809_s19, %s809_s19, %s810_s20  }
  0x13   :  { %s811_s23 = smov [#allocation5]   ;;  %s758_s27 = scalar_lea.hbm %s961_s1, 16384 }
  0x14   :  { %s35_s24 = sshll.u32 %s811_s23, 4  ;;  %p759_p8 = scmp.ne.s32.totalorder %s961_s1, %s758_s27  ;;  %s36_s24 = int_to_ptr.vmem [resolvable:$true] %s35_s24 }
  0x15   :  { %p762_p9 = scmp.lt.u32.totalorder %s758_s27, %s961_s1 }
  0x17   :  { %p764_p10 = pnand %p762_p9, %p759_p8 }
  0x19   :  { %767 = shalt.err (!%p764_p10)
}
  0x1a   :  { %s768_s4 = scalar_lea.vmem %s36_s24, 16384  ;;  %p773_p12 = scmp.lt.s32.totalorder %s36_s24, %s36_s24 }
  0x1b   :  { %p769_p11 = scmp.ne.s32.totalorder %s36_s24, %s768_s4  ;;  %p774_p13 = scmp.lt.s32.totalorder %s768_s4, %s768_s4 }
  0x1d   :  { %p775_p0 = por %p774_p13, %p773_p12 }
  0x1f   :  { %p776_p1 = pnand %p775_p0, %p769_p11 }
  0x21   :  { %779 = shalt.err (!%p776_p1)
}
  0x22   :  { %41 = dma.hbm_to_vmem [thread:$0]  %s961_s1, 16384, %s36_s24, [#allocation6], %s809_s19, %s809_s19, %s810_s20  }
  0x23   :  { %802 = dma.done.wait [#allocation3], 16384  }
  0x24   :  { %803 = vsyncadd [#allocation3], 4294950912 }
  0x25   :  { %804 = dma.done.wait [#allocation6], 16384  }
  0x26   :  { %805 = vsyncadd [#allocation6], 4294950912  ;;  %v57_v0 = vld [vmem:[#allocation2] sm:$0xff]  ;;  %v58_v1 = vld [vmem:[#allocation2 + $0x8] sm:$0xff]  ;;  %s812_s1 = smov [#allocation7]  }
  0x27   :  { %v59_v2 = vld [vmem:[#allocation2 + $0x10] sm:$0xff]  ;;  %v73_v3 = vld [vmem:[#allocation5] sm:$0xff]  ;;  %v74_v4 = vld [vmem:[#allocation5 + $0x8] sm:$0xff]  ;;  %s720_s6 = sshll.u32 %s812_s1, 4  ;;  %s721_s6 = int_to_ptr.vmem [resolvable:$true] %s720_s6 }
  0x28   :  { %v75_v5 = vld [vmem:[#allocation5 + $0x10] sm:$0xff]  ;;  %v89_v6 = vsub.f32 %v57_v0, %v73_v3  ;;  %v90_v7 = vsub.f32 %v58_v1, %v74_v4  ;;  %v60_v8 = vld [vmem:[#allocation2 + $0x18] sm:$0xff]  ;;  %v61_v11 = vld [vmem:[#allocation2 + $0x20] sm:$0xff]  ;;  %s780_s7 = scalar_lea.vmem %s721_s6, 128  ;;  %p785_p3 = scmp.lt.s32.totalorder %s721_s6, %s721_s6 }
  0x29   :  { %v76_v9 = vld [vmem:[#allocation5 + $0x18] sm:$0xff]  ;;  %v91_v10 = vsub.f32 %v59_v2, %v75_v5  ;;  %v77_v12 = vld [vmem:[#allocation5 + $0x20] sm:$0xff]  ;;  %v62_v16 = vld [vmem:[#allocation2 + $0x28] sm:$0xff]  ;;  %p781_p2 = scmp.ne.s32.totalorder %s721_s6, %s780_s7  ;;  %p786_p4 = scmp.lt.s32.totalorder %s780_s7, %s780_s7 }
  0x2a   :  { %v92_v13 = vsub.f32 %v60_v8, %v76_v9  ;;  %v105_v14 = vmul.f32 %v89_v6, %v89_v6  ;;  %v106_v15 = vmul.f32 %v90_v7, %v90_v7  ;;  %v78_v17 = vld [vmem:[#allocation5 + $0x28] sm:$0xff]  ;;  %v93_v18 = vsub.f32 %v61_v11, %v77_v12  ;;  %v63_v20 = vld [vmem:[#allocation2 + $0x30] sm:$0xff]  ;;  %v138_v25 = vld [vmem:[#allocation2 + $0x80] sm:$0xff] }
  0x2b   :  { %v107_v19 = vmul.f32 %v91_v10, %v91_v10  ;;  %v79_v21 = vld [vmem:[#allocation5 + $0x30] sm:$0xff]  ;;  %v94_v22 = vsub.f32 %v62_v16, %v78_v17  ;;  %v139_v26 = vld [vmem:[#allocation2 + $0x88] sm:$0xff]  ;;  %v64_v27 = vld [vmem:[#allocation2 + $0x38] sm:$0xff]  ;;  %p787_p5 = por %p786_p4, %p785_p3 }
  0x2c   :  { %v108_v23 = vmul.f32 %v92_v13, %v92_v13  ;;  %v121_v24 = vadd.f32 %v106_v15, %v105_v14  ;;  %v95_v28 = vsub.f32 %v63_v20, %v79_v21  ;;  %v109_v29 = vmul.f32 %v93_v18, %v93_v18  ;;  %v155_v31 = vld [vmem:[#allocation5 + $0x80] sm:$0xff]  ;;  %v156_v32 = vld [vmem:[#allocation5 + $0x88] sm:$0xff]  ;;  %v80_v33 = vld [vmem:[#allocation5 + $0x38] sm:$0xff] }
  0x2d   :  { %v140_v34 = vld [vmem:[#allocation2 + $0x90] sm:$0xff]  ;;  %v110_v36 = vmul.f32 %v94_v22, %v94_v22  ;;  %v171_v38 = vsub.f32 %v138_v25, %v155_v31  ;;  %v172_v39 = vsub.f32 %v139_v26, %v156_v32  ;;  %v141_v40 = vld [vmem:[#allocation2 + $0x98] sm:$0xff]  ;;  %v65_v42 = vld [vmem:[#allocation2 + $0x40] sm:$0xff]  ;;  %v96_v44 = vsub.f32 %v64_v27, %v80_v33  ;;  %p788_p6 = pnand %p787_p5, %p781_p2 }
  0x2e   :  { %v122_v30 = vadd.f32 %v121_v24, %v107_v19  ;;  %v157_v35 = vld [vmem:[#allocation5 + $0x90] sm:$0xff]  ;;  %v158_v41 = vld [vmem:[#allocation5 + $0x98] sm:$0xff]  ;;  %v81_v43 = vld [vmem:[#allocation5 + $0x40] sm:$0xff]  ;;  %v111_v45 = vmul.f32 %v95_v28, %v95_v28 }
  0x2f   :  { %v173_v47 = vsub.f32 %v140_v34, %v157_v35  ;;  %v142_v48 = vld [vmem:[#allocation2 + $0xa0] sm:$0xff]  ;;  %v174_v51 = vsub.f32 %v141_v40, %v158_v41  ;;  %v187_v52 = vmul.f32 %v171_v38, %v171_v38  ;;  %v188_v53 = vmul.f32 %v172_v39, %v172_v39  ;;  %v143_v55 = vld [vmem:[#allocation2 + $0xa8] sm:$0xff]  ;;  %v144_v63 = vld [vmem:[#allocation2 + $0xb0] sm:$0xff] }
  0x30   :  { %v123_v37 = vadd.f32 %v122_v30, %v108_v23  ;;  %v159_v49 = vld [vmem:[#allocation5 + $0xa0] sm:$0xff]  ;;  %v97_v54 = vsub.f32 %v65_v42, %v81_v43  ;;  %v160_v56 = vld [vmem:[#allocation5 + $0xa8] sm:$0xff]  ;;  %v112_v59 = vmul.f32 %v96_v44, %v96_v44  ;;  %v161_v0 = vld [vmem:[#allocation5 + $0xb0] sm:$0xff] }
  0x31   :  { %v66_v57 = vld [vmem:[#allocation2 + $0x48] sm:$0xff]  ;;  %v175_v61 = vsub.f32 %v142_v48, %v159_v49  ;;  %v189_v62 = vmul.f32 %v173_v47, %v173_v47  ;;  %v176_v1 = vsub.f32 %v143_v55, %v160_v56  ;;  %v190_v2 = vmul.f32 %v174_v51, %v174_v51  ;;  %v220_v4 = vld [vmem:[#allocation2 + $0x100] sm:$0xff]  ;;  %v67_v9 = vld [vmem:[#allocation2 + $0x50] sm:$0xff] }
  0x32   :  { %v124_v46 = vadd.f32 %v123_v37, %v109_v29  ;;  %v82_v58 = vld [vmem:[#allocation5 + $0x48] sm:$0xff]  ;;  %v203_v3 = vadd.f32 %v188_v53, %v187_v52  ;;  %v237_v7 = vld [vmem:[#allocation5 + $0x100] sm:$0xff]  ;;  %v83_v10 = vld [vmem:[#allocation5 + $0x50] sm:$0xff]  ;;  %v113_v11 = vmul.f32 %v97_v54, %v97_v54  ;;  %v177_v15 = vsub.f32 %v144_v63, %v161_v0 }
  0x33   :  { %v98_v5 = vsub.f32 %v66_v57, %v82_v58  ;;  %v221_v6 = vld [vmem:[#allocation2 + $0x108] sm:$0xff]  ;;  %v191_v13 = vmul.f32 %v175_v61, %v175_v61  ;;  %v222_v16 = vld [vmem:[#allocation2 + $0x110] sm:$0xff]  ;;  %v145_v18 = vld [vmem:[#allocation2 + $0xb8] sm:$0xff]  ;;  %v192_v20 = vmul.f32 %v176_v1, %v176_v1  ;;  %v253_v22 = vsub.f32 %v220_v4, %v237_v7 }
  0x34   :  { %v125_v50 = vadd.f32 %v124_v46, %v110_v36  ;;  %v238_v8 = vld [vmem:[#allocation5 + $0x108] sm:$0xff]  ;;  %v204_v14 = vadd.f32 %v203_v3, %v189_v62  ;;  %v239_v17 = vld [vmem:[#allocation5 + $0x110] sm:$0xff]  ;;  %v162_v19 = vld [vmem:[#allocation5 + $0xb8] sm:$0xff]  ;;  %v99_v25 = vsub.f32 %v67_v9, %v83_v10  ;;  %v193_v39 = vmul.f32 %v177_v15, %v177_v15 }
  0x35   :  { %v254_v23 = vsub.f32 %v221_v6, %v238_v8  ;;  %v68_v24 = vld [vmem:[#allocation2 + $0x58] sm:$0xff]  ;;  %v69_v28 = vld [vmem:[#allocation2 + $0x60] sm:$0xff]  ;;  %v114_v31 = vmul.f32 %v98_v5, %v98_v5  ;;  %v255_v34 = vsub.f32 %v222_v16, %v239_v17  ;;  %v70_v35 = vld [vmem:[#allocation2 + $0x68] sm:$0xff]  ;;  %v178_v38 = vsub.f32 %v145_v18, %v162_v19 }
  0x36   :  { %v126_v60 = vadd.f32 %v125_v50, %v111_v45  ;;  %v205_v21 = vadd.f32 %v204_v14, %v190_v2  ;;  %v223_v26 = vld [vmem:[#allocation2 + $0x118] sm:$0xff]  ;;  %v85_v30 = vld [vmem:[#allocation5 + $0x60] sm:$0xff]  ;;  %v86_v36 = vld [vmem:[#allocation5 + $0x68] sm:$0xff]  ;;  %v269_v45 = vmul.f32 %v253_v22, %v253_v22  ;;  %v115_v54 = vmul.f32 %v99_v25, %v99_v25 }
  0x37   :  { %v240_v27 = vld [vmem:[#allocation5 + $0x118] sm:$0xff]  ;;  %v146_v37 = vld [vmem:[#allocation2 + $0xc0] sm:$0xff]  ;;  %v270_v46 = vmul.f32 %v254_v23, %v254_v23  ;;  %v71_v47 = vld [vmem:[#allocation2 + $0x70] sm:$0xff]  ;;  %v101_v50 = vsub.f32 %v69_v28, %v85_v30  ;;  %v102_v53 = vsub.f32 %v70_v35, %v86_v36  ;;  %v271_v56 = vmul.f32 %v255_v34, %v255_v34 }
  0x38   :  { %v127_v12 = vadd.f32 %v126_v60, %v112_v59  ;;  %v84_v29 = vld [vmem:[#allocation5 + $0x58] sm:$0xff]  ;;  %v206_v33 = vadd.f32 %v205_v21, %v191_v13  ;;  %v163_v40 = vld [vmem:[#allocation5 + $0xc0] sm:$0xff]  ;;  %v256_v44 = vsub.f32 %v223_v26, %v240_v27  ;;  %v87_v48 = vld [vmem:[#allocation5 + $0x70] sm:$0xff]  ;;  %v194_v60 = vmul.f32 %v178_v38, %v178_v38 }
  0x39   :  { %v224_v42 = vld [vmem:[#allocation2 + $0x120] sm:$0xff]  ;;  %v100_v49 = vsub.f32 %v68_v24, %v84_v29  ;;  %v72_v51 = vld [vmem:[#allocation2 + $0x78] sm:$0xff]  ;;  %v147_v57 = vld [vmem:[#allocation2 + $0xc8] sm:$0xff]  ;;  %v179_v59 = vsub.f32 %v146_v37, %v163_v40  ;;  %v103_v63 = vsub.f32 %v71_v47, %v87_v48  ;;  %v285_v8 = vadd.f32 %v270_v46, %v269_v45 }
  0x3a   :  { %v128_v32 = vadd.f32 %v127_v12, %v113_v11  ;;  %v207_v41 = vadd.f32 %v206_v33, %v192_v20  ;;  %v241_v43 = vld [vmem:[#allocation5 + $0x120] sm:$0xff]  ;;  %v88_v52 = vld [vmem:[#allocation5 + $0x78] sm:$0xff]  ;;  %v164_v58 = vld [vmem:[#allocation5 + $0xc8] sm:$0xff]  ;;  %v272_v7 = vmul.f32 %v256_v44, %v256_v44  ;;  %v117_v12 = vmul.f32 %v101_v50, %v101_v50 }
  0x3b   :  { %v257_v62 = vsub.f32 %v224_v42, %v241_v43  ;;  %v148_v0 = vld [vmem:[#allocation2 + $0xd0] sm:$0xff]  ;;  %v149_v1 = vld [vmem:[#allocation2 + $0xd8] sm:$0xff]  ;;  %v150_v2 = vld [vmem:[#allocation2 + $0xe0] sm:$0xff]  ;;  %v104_v10 = vsub.f32 %v72_v51, %v88_v52  ;;  %v116_v11 = vmul.f32 %v100_v49, %v100_v49  ;;  %v852_v17 = vmul.f32 %v102_v53, %v102_v53 }
  0x3c   :  { %v129_v55 = vadd.f32 %v128_v32, %v114_v31  ;;  %v208_v61 = vadd.f32 %v207_v41, %v193_v39  ;;  %v151_v3 = vld [vmem:[#allocation2 + $0xe8] sm:$0xff]  ;;  %v165_v4 = vld [vmem:[#allocation5 + $0xd0] sm:$0xff]  ;;  %v302_v9 = vld [vmem:[#allocation2 + $0x180] sm:$0xff]  ;;  %v180_v22 = vsub.f32 %v147_v57, %v164_v58  ;;  %v286_v23 = vadd.f32 %v285_v8, %v271_v56 }
  0x3d   :  { %v225_v5 = vld [vmem:[#allocation2 + $0x128] sm:$0xff]  ;;  %v152_v13 = vld [vmem:[#allocation2 + $0xf0] sm:$0xff]  ;;  %v319_v15 = vld [vmem:[#allocation5 + $0x180] sm:$0xff]  ;;  %v195_v25 = vmul.f32 %v179_v59, %v179_v59  ;;  %v273_v30 = vmul.f32 %v257_v62, %v257_v62  ;;  %v854_v31 = vmul.f32 %v103_v63, %v103_v63  ;;  %v181_v39 = vsub.f32 %v148_v0, %v165_v4 }
  0x3e   :  { %v242_v6 = vld [vmem:[#allocation5 + $0x128] sm:$0xff]  ;;  %v130_v18 = vadd.f32 %v129_v55, %v115_v54  ;;  %v166_v19 = vld [vmem:[#allocation5 + $0xd8] sm:$0xff]  ;;  %v167_v20 = vld [vmem:[#allocation5 + $0xe0] sm:$0xff]  ;;  %v209_v26 = vadd.f32 %v208_v61, %v194_v60  ;;  %v287_v32 = vadd.f32 %v286_v23, %v272_v7  ;;  %v335_v35 = vsub.f32 %v302_v9, %v319_v15 }
  0x3f   :  { %v303_v14 = vld [vmem:[#allocation2 + $0x188] sm:$0xff]  ;;  %v169_v24 = vld [vmem:[#allocation5 + $0xf0] sm:$0xff]  ;;  %v258_v29 = vsub.f32 %v225_v5, %v242_v6  ;;  %v153_v37 = vld [vmem:[#allocation2 + $0xf8] sm:$0xff]  ;;  %v182_v40 = vsub.f32 %v149_v1, %v166_v19  ;;  %v183_v41 = vsub.f32 %v150_v2, %v167_v20  ;;  %v196_v45 = vmul.f32 %v180_v22, %v180_v22 }
  0x40   :  { %v320_v16 = vld [vmem:[#allocation5 + $0x188] sm:$0xff]  ;;  %v226_v27 = vld [vmem:[#allocation2 + $0x130] sm:$0xff]  ;;  %v170_v38 = vld [vmem:[#allocation5 + $0xf8] sm:$0xff]  ;;  %v131_v43 = vadd.f32 %v130_v18, %v116_v11  ;;  %v185_v44 = vsub.f32 %v152_v13, %v169_v24  ;;  %v210_v48 = vadd.f32 %v209_v26, %v195_v25  ;;  %v288_v53 = vadd.f32 %v287_v32, %v273_v30 }
  0x41   :  { %v168_v21 = vld [vmem:[#allocation5 + $0xe8] sm:$0xff]  ;;  %v243_v28 = vld [vmem:[#allocation5 + $0x130] sm:$0xff]  ;;  %v336_v36 = vsub.f32 %v303_v14, %v320_v16  ;;  %v227_v46 = vld [vmem:[#allocation2 + $0x138] sm:$0xff]  ;;  %v274_v52 = vmul.f32 %v258_v29, %v258_v29  ;;  %v856_v55 = vmul.f32 %v104_v10, %v104_v10  ;;  %v186_v56 = vsub.f32 %v153_v37, %v170_v38 }
  0x42   :  { %v304_v33 = vld [vmem:[#allocation2 + $0x190] sm:$0xff]  ;;  %v184_v42 = vsub.f32 %v151_v3, %v168_v21  ;;  %v259_v47 = vsub.f32 %v226_v27, %v243_v28  ;;  %v228_v49 = vld [vmem:[#allocation2 + $0x140] sm:$0xff]  ;;  %v229_v50 = vld [vmem:[#allocation2 + $0x148] sm:$0xff]  ;;  %v351_v63 = vmul.f32 %v335_v35, %v335_v35  ;;  %v197_v1 = vmul.f32 %v181_v39, %v181_v39 }
  0x43   :  { %v321_v34 = vld [vmem:[#allocation5 + $0x190] sm:$0xff]  ;;  %v244_v51 = vld [vmem:[#allocation5 + $0x138] sm:$0xff]  ;;  %v232_v59 = vld [vmem:[#allocation2 + $0x160] sm:$0xff]  ;;  %v352_v0 = vmul.f32 %v336_v36, %v336_v36  ;;  %v858_v2 = vmul.f32 %v182_v40, %v182_v40  ;;  %v860_v3 = vmul.f32 %v183_v41, %v183_v41  ;;  %v132_v9 = vadd.f32 %v131_v43, %v117_v12 }
  0x44   :  { %v337_v54 = vsub.f32 %v304_v33, %v321_v34  ;;  %v230_v57 = vld [vmem:[#allocation2 + $0x150] sm:$0xff]  ;;  %v231_v58 = vld [vmem:[#allocation2 + $0x158] sm:$0xff]  ;;  %v233_v60 = vld [vmem:[#allocation2 + $0x168] sm:$0xff]  ;;  %v862_v4 = vmul.f32 %v184_v42, %v184_v42  ;;  %v864_v10 = vmul.f32 %v185_v44, %v185_v44  ;;  %v260_v15 = vsub.f32 %v227_v46, %v244_v51 }
  0x45   :  { %v305_v61 = vld [vmem:[#allocation2 + $0x198] sm:$0xff]  ;;  %v234_v5 = vld [vmem:[#allocation2 + $0x170] sm:$0xff]  ;;  %v245_v6 = vld [vmem:[#allocation5 + $0x140] sm:$0xff]  ;;  %v275_v16 = vmul.f32 %v259_v47, %v259_v47  ;;  %v211_v18 = vadd.f32 %v210_v48, %v196_v45  ;;  %v289_v20 = vadd.f32 %v288_v53, %v274_v52  ;;  %v866_v25 = vmul.f32 %v186_v56, %v186_v56 }
  0x46   :  { %v322_v62 = vld [vmem:[#allocation5 + $0x198] sm:$0xff]  ;;  %v246_v7 = vld [vmem:[#allocation5 + $0x148] sm:$0xff]  ;;  %v247_v8 = vld [vmem:[#allocation5 + $0x150] sm:$0xff]  ;;  %v353_v24 = vmul.f32 %v337_v54, %v337_v54  ;;  %v261_v28 = vsub.f32 %v228_v49, %v245_v6  ;;  %v367_v29 = vadd.f32 %v352_v0, %v351_v63  ;;  %v133_v39 = vadd.f32 %v132_v9, %v852_v17 }
  0x47   :  { %v248_v11 = vld [vmem:[#allocation5 + $0x158] sm:$0xff]  ;;  %v249_v13 = vld [vmem:[#allocation5 + $0x160] sm:$0xff]  ;;  %v250_v14 = vld [vmem:[#allocation5 + $0x168] sm:$0xff]  ;;  %v338_v23 = vsub.f32 %v305_v61, %v322_v62  ;;  %v262_v12 = vsub.f32 %v229_v50, %v246_v7  ;;  %v263_v32 = vsub.f32 %v230_v57, %v247_v8  ;;  %v276_v41 = vmul.f32 %v260_v15, %v260_v15 }
  0x48   :  { %v251_v19 = vld [vmem:[#allocation5 + $0x170] sm:$0xff]  ;;  %v306_v21 = vld [vmem:[#allocation2 + $0x1a0] sm:$0xff]  ;;  %v235_v26 = vld [vmem:[#allocation2 + $0x178] sm:$0xff]  ;;  %v264_v33 = vsub.f32 %v231_v58, %v248_v11  ;;  %v265_v34 = vsub.f32 %v232_v59, %v249_v13  ;;  %v266_v35 = vsub.f32 %v233_v60, %v250_v14  ;;  %v212_v44 = vadd.f32 %v211_v18, %v197_v1 }
  0x49   :  { %v323_v22 = vld [vmem:[#allocation5 + $0x1a0] sm:$0xff]  ;;  %v252_v27 = vld [vmem:[#allocation5 + $0x178] sm:$0xff]  ;;  %v385_v36 = vld [vmem:[#allocation2 + $0x208] sm:$0xff]  ;;  %v267_v40 = vsub.f32 %v234_v5, %v251_v19  ;;  %v290_v45 = vadd.f32 %v289_v20, %v275_v16  ;;  %v354_v47 = vmul.f32 %v338_v23, %v338_v23  ;;  %v368_v48 = vadd.f32 %v367_v29, %v353_v24 }
  0x4a   :  { %v384_v30 = vld [vmem:[#allocation2 + $0x200] sm:$0xff]  ;;  %v402_v38 = vld [vmem:[#allocation5 + $0x208] sm:$0xff]  ;;  %v339_v43 = vsub.f32 %v306_v21, %v323_v22  ;;  %v386_v49 = vld [vmem:[#allocation2 + $0x210] sm:$0xff]  ;;  %v268_v51 = vsub.f32 %v235_v26, %v252_v27  ;;  %v277_v52 = vmul.f32 %v261_v28, %v261_v28  ;;  %v869_v59 = vmul.f32 %v262_v12, %v262_v12 }
  0x4b   :  { %v401_v37 = vld [vmem:[#allocation5 + $0x200] sm:$0xff]  ;;  %v307_v42 = vld [vmem:[#allocation2 + $0x1a8] sm:$0xff]  ;;  %v403_v50 = vld [vmem:[#allocation5 + $0x210] sm:$0xff]  ;;  %v418_v58 = vsub.f32 %v385_v36, %v402_v38  ;;  %v871_v17 = vmul.f32 %v263_v32, %v263_v32  ;;  %v873_v60 = vmul.f32 %v264_v33, %v264_v33  ;;  %v875_v61 = vmul.f32 %v265_v34, %v265_v34 }
  0x4c   :  { %v324_v46 = vld [vmem:[#allocation5 + $0x1a8] sm:$0xff]  ;;  %v308_v53 = vld [vmem:[#allocation2 + $0x1b0] sm:$0xff]  ;;  %v309_v54 = vld [vmem:[#allocation2 + $0x1b8] sm:$0xff]  ;;  %v417_v57 = vsub.f32 %v384_v30, %v401_v37  ;;  %v134_v1 = vadd.f32 %v133_v39, %v854_v31  ;;  %v878_v5 = vmul.f32 %v266_v35, %v266_v35  ;;  %v419_v11 = vsub.f32 %v386_v49, %v403_v50 }
  0x4d   :  { %v310_v56 = vld [vmem:[#allocation2 + $0x1c0] sm:$0xff]  ;;  %v311_v62 = vld [vmem:[#allocation2 + $0x1c8] sm:$0xff]  ;;  %v387_v63 = vld [vmem:[#allocation2 + $0x218] sm:$0xff]  ;;  %v340_v9 = vsub.f32 %v307_v42, %v324_v46  ;;  %v213_v13 = vadd.f32 %v212_v44, %v858_v2  ;;  %v291_v14 = vadd.f32 %v290_v45, %v276_v41  ;;  %v355_v19 = vmul.f32 %v339_v43, %v339_v43 }
  0x4e   :  { %v404_v0 = vld [vmem:[#allocation5 + $0x218] sm:$0xff]  ;;  %v325_v6 = vld [vmem:[#allocation5 + $0x1b0] sm:$0xff]  ;;  %v327_v8 = vld [vmem:[#allocation5 + $0x1c0] sm:$0xff]  ;;  %v369_v20 = vadd.f32 %v368_v48, %v354_v47  ;;  %v881_v23 = vmul.f32 %v267_v40, %v267_v40  ;;  %v433_v12 = vmul.f32 %v417_v57, %v417_v57  ;;  %v434_v29 = vmul.f32 %v418_v58, %v418_v58 }
  0x4f   :  { %v326_v7 = vld [vmem:[#allocation5 + $0x1b8] sm:$0xff]  ;;  %v312_v15 = vld [vmem:[#allocation2 + $0x1d0] sm:$0xff]  ;;  %v328_v18 = vld [vmem:[#allocation5 + $0x1c8] sm:$0xff]  ;;  %v420_v28 = vsub.f32 %v387_v63, %v404_v0  ;;  %v883_v30 = vmul.f32 %v268_v51, %v268_v51  ;;  %v341_v34 = vsub.f32 %v308_v53, %v325_v6  ;;  %v343_v36 = vsub.f32 %v310_v56, %v327_v8 }
  0x50   :  { %v313_v16 = vld [vmem:[#allocation2 + $0x1d8] sm:$0xff]  ;;  %v388_v21 = vld [vmem:[#allocation2 + $0x220] sm:$0xff]  ;;  %v315_v24 = vld [vmem:[#allocation2 + $0x1e8] sm:$0xff]  ;;  %v342_v35 = vsub.f32 %v309_v54, %v326_v7  ;;  %v886_v37 = vadd.f32 %v134_v1, %v856_v55  ;;  %v344_v39 = vsub.f32 %v311_v62, %v328_v18  ;;  %v435_v43 = vmul.f32 %v419_v11, %v419_v11 }
  0x51   :  { %v405_v22 = vld [vmem:[#allocation5 + $0x220] sm:$0xff]  ;;  %v316_v26 = vld [vmem:[#allocation2 + $0x1f0] sm:$0xff]  ;;  %v330_v2 = vld [vmem:[#allocation5 + $0x1d8] sm:$0xff]  ;;  %v214_v44 = vadd.f32 %v213_v13, %v860_v3  ;;  %v292_v45 = vadd.f32 %v291_v14, %v277_v52  ;;  %v356_v48 = vmul.f32 %v340_v9, %v340_v9  ;;  %v370_v49 = vadd.f32 %v369_v20, %v355_v19 }
  0x52   :  { %v314_v31 = vld [vmem:[#allocation2 + $0x1e0] sm:$0xff]  ;;  %v329_v27 = vld [vmem:[#allocation5 + $0x1d0] sm:$0xff]  ;;  %v332_v33 = vld [vmem:[#allocation5 + $0x1e8] sm:$0xff]  ;;  %v421_v42 = vsub.f32 %v388_v21, %v405_v22  ;;  %v346_v51 = vsub.f32 %v313_v16, %v330_v2  ;;  %v436_v53 = vmul.f32 %v420_v28, %v420_v28  ;;  %v449_v54 = vadd.f32 %v434_v29, %v433_v12 }
  0x53   :  { %v331_v32 = vld [vmem:[#allocation5 + $0x1e0] sm:$0xff]  ;;  %v333_v38 = vld [vmem:[#allocation5 + $0x1f0] sm:$0xff]  ;;  %v389_v40 = vld [vmem:[#allocation2 + $0x228] sm:$0xff]  ;;  %v345_v50 = vsub.f32 %v312_v15, %v329_v27  ;;  %v348_v57 = vsub.f32 %v315_v24, %v332_v33  ;;  %v357_v7 = vmul.f32 %v341_v34, %v341_v34  ;;  %v215_v9 = vadd.f32 %v214_v44, %v862_v4 }
  0x54   :  { %v406_v41 = vld [vmem:[#allocation5 + $0x228] sm:$0xff]  ;;  %v317_v46 = vld [vmem:[#allocation2 + $0x1f8] sm:$0xff]  ;;  %v466_v56 = vld [vmem:[#allocation2 + $0x280] sm:$0xff]  ;;  %v347_v55 = vsub.f32 %v314_v31, %v331_v32  ;;  %v349_v58 = vsub.f32 %v316_v26, %v333_v38  ;;  %v437_v8 = vmul.f32 %v421_v42, %v421_v42  ;;  %v450_v11 = vadd.f32 %v449_v54, %v435_v43 }
  0x55   :  { %v334_v47 = vld [vmem:[#allocation5 + $0x1f8] sm:$0xff]  ;;  %v422_v62 = vsub.f32 %v389_v40, %v406_v41  ;;  %v467_v63 = vld [vmem:[#allocation2 + $0x288] sm:$0xff]  ;;  %v483_v0 = vld [vmem:[#allocation5 + $0x280] sm:$0xff]  ;;  %v293_v13 = vadd.f32 %v292_v45, %v869_v59  ;;  %v358_v14 = vmul.f32 %v342_v35, %v342_v35  ;;  %v371_v15 = vadd.f32 %v370_v49, %v356_v48 }
  0x56   :  { %v484_v1 = vld [vmem:[#allocation5 + $0x288] sm:$0xff]  ;;  %v350_v6 = vsub.f32 %v317_v46, %v334_v47  ;;  %v390_v3 = vld [vmem:[#allocation2 + $0x230] sm:$0xff]  ;;  %v891_v19 = vmul.f32 %v343_v36, %v343_v36  ;;  %v391_v20 = vld [vmem:[#allocation2 + $0x238] sm:$0xff]  ;;  %v451_v21 = vadd.f32 %v450_v11, %v436_v53  ;;  %v499_v22 = vsub.f32 %v466_v56, %v483_v0 }
  0x57   :  { %v407_v52 = vld [vmem:[#allocation5 + $0x230] sm:$0xff]  ;;  %v500_v31 = vsub.f32 %v467_v63, %v484_v1  ;;  %v893_v24 = vmul.f32 %v344_v39, %v344_v39  ;;  %v895_v26 = vmul.f32 %v345_v50, %v345_v50  ;;  %v392_v27 = vld [vmem:[#allocation2 + $0x240] sm:$0xff]  ;;  %v393_v28 = vld [vmem:[#allocation2 + $0x248] sm:$0xff]  ;;  %v438_v4 = vmul.f32 %v422_v62, %v422_v62 }
  0x58   :  { %v468_v16 = vld [vmem:[#allocation2 + $0x290] sm:$0xff]  ;;  %v423_v12 = vsub.f32 %v390_v3, %v407_v52  ;;  %v469_v29 = vld [vmem:[#allocation2 + $0x298] sm:$0xff]  ;;  %v897_v2 = vmul.f32 %v346_v51, %v346_v51  ;;  %v899_v32 = vmul.f32 %v347_v55, %v347_v55  ;;  %v409_v35 = vld [vmem:[#allocation5 + $0x240] sm:$0xff]  ;;  %v452_v36 = vadd.f32 %v451_v21, %v437_v8 }
  0x59   :  { %v485_v18 = vld [vmem:[#allocation5 + $0x290] sm:$0xff]  ;;  %v486_v59 = vld [vmem:[#allocation5 + $0x298] sm:$0xff]  ;;  %v216_v39 = vadd.f32 %v215_v9, %v864_v10  ;;  %v294_v40 = vadd.f32 %v293_v13, %v871_v17  ;;  %v903_v41 = vmul.f32 %v348_v57, %v348_v57  ;;  %v372_v42 = vadd.f32 %v371_v15, %v357_v7  ;;  %v410_v44 = vld [vmem:[#allocation5 + $0x248] sm:$0xff] }
  0x5a   :  { %v394_v33 = vld [vmem:[#allocation2 + $0x250] sm:$0xff]  ;;  %v408_v34 = vld [vmem:[#allocation5 + $0x238] sm:$0xff]  ;;  %v501_v38 = vsub.f32 %v468_v16, %v485_v18  ;;  %v470_v45 = vld [vmem:[#allocation2 + $0x2a0] sm:$0xff]  ;;  %v905_v47 = vmul.f32 %v349_v58, %v349_v58  ;;  %v502_v51 = vsub.f32 %v469_v29, %v486_v59  ;;  %v515_v53 = vmul.f32 %v499_v22, %v499_v22 }
  0x5b   :  { %v395_v43 = vld [vmem:[#allocation2 + $0x258] sm:$0xff]  ;;  %v487_v46 = vld [vmem:[#allocation5 + $0x2a0] sm:$0xff]  ;;  %v397_v49 = vld [vmem:[#allocation2 + $0x268] sm:$0xff]  ;;  %v516_v54 = vmul.f32 %v500_v31, %v500_v31  ;;  %v907_v56 = vmul.f32 %v350_v6, %v350_v6  ;;  %v424_v55 = vsub.f32 %v391_v20, %v408_v34  ;;  %v439_v17 = vmul.f32 %v423_v12, %v423_v12 }
  0x5c   :  { %v396_v48 = vld [vmem:[#allocation2 + $0x260] sm:$0xff]  ;;  %v411_v50 = vld [vmem:[#allocation5 + $0x250] sm:$0xff]  ;;  %v412_v10 = vld [vmem:[#allocation5 + $0x258] sm:$0xff]  ;;  %v453_v57 = vadd.f32 %v452_v36, %v438_v4  ;;  %v425_v3 = vsub.f32 %v392_v27, %v409_v35  ;;  %v426_v58 = vsub.f32 %v393_v28, %v410_v44  ;;  %v503_v52 = vsub.f32 %v470_v45, %v487_v46 }
  0x5d   :  { %v471_v62 = vld [vmem:[#allocation2 + $0x2a8] sm:$0xff]  ;;  %v398_v0 = vld [vmem:[#allocation2 + $0x270] sm:$0xff]  ;;  %v413_v1 = vld [vmem:[#allocation5 + $0x260] sm:$0xff]  ;;  %v517_v8 = vmul.f32 %v501_v38, %v501_v38  ;;  %v217_v11 = vadd.f32 %v216_v39, %v866_v25  ;;  %v295_v9 = vadd.f32 %v294_v40, %v873_v60  ;;  %v373_v13 = vadd.f32 %v372_v42, %v358_v14 }
  0x5e   :  { %v488_v63 = vld [vmem:[#allocation5 + $0x2a8] sm:$0xff]  ;;  %v415_v6 = vld [vmem:[#allocation5 + $0x270] sm:$0xff]  ;;  %v427_v15 = vsub.f32 %v394_v33, %v411_v50  ;;  %v428_v20 = vsub.f32 %v395_v43, %v412_v10  ;;  %v473_v21 = vld [vmem:[#allocation2 + $0x2b8] sm:$0xff]  ;;  %v518_v12 = vmul.f32 %v502_v51, %v502_v51  ;;  %v531_v4 = vadd.f32 %v516_v54, %v515_v53 }
  0x5f   :  { %v414_v7 = vld [vmem:[#allocation5 + $0x268] sm:$0xff]  ;;  %v472_v16 = vld [vmem:[#allocation2 + $0x2b0] sm:$0xff]  ;;  %v490_v22 = vld [vmem:[#allocation5 + $0x2b8] sm:$0xff]  ;;  %v504_v31 = vsub.f32 %v471_v62, %v488_v63  ;;  %v429_v27 = vsub.f32 %v396_v48, %v413_v1  ;;  %v440_v59 = vmul.f32 %v424_v55, %v424_v55  ;;  %v454_v34 = vadd.f32 %v453_v57, %v439_v17 }
  0x60   :  { %v489_v18 = vld [vmem:[#allocation5 + $0x2b0] sm:$0xff]  ;;  %v548_v29 = vld [vmem:[#allocation2 + $0x300] sm:$0xff]  ;;  %v430_v28 = vsub.f32 %v397_v49, %v414_v7  ;;  %v549_v35 = vld [vmem:[#allocation2 + $0x308] sm:$0xff]  ;;  %v431_v38 = vsub.f32 %v398_v0, %v415_v6  ;;  %v519_v40 = vmul.f32 %v503_v52, %v503_v52  ;;  %v532_v42 = vadd.f32 %v531_v4, %v517_v8 }
  0x61   :  { %v565_v25 = vld [vmem:[#allocation5 + $0x300] sm:$0xff]  ;;  %v566_v36 = vld [vmem:[#allocation5 + $0x308] sm:$0xff]  ;;  %v399_v60 = vld [vmem:[#allocation2 + $0x278] sm:$0xff]  ;;  %v505_v39 = vsub.f32 %v472_v16, %v489_v18  ;;  %v912_v43 = vadd.f32 %v217_v11, %v886_v37  ;;  %v296_v44 = vadd.f32 %v295_v9, %v875_v61  ;;  %v374_v45 = vadd.f32 %v373_v13, %v891_v19 }
  0x62   :  { %v416_v14 = vld [vmem:[#allocation5 + $0x278] sm:$0xff]  ;;  %v474_v33 = vld [vmem:[#allocation2 + $0x2c0] sm:$0xff]  ;;  %v506_v48 = vsub.f32 %v473_v21, %v490_v22  ;;  %v550_v49 = vld [vmem:[#allocation2 + $0x310] sm:$0xff]  ;;  %v520_v51 = vmul.f32 %v504_v31, %v504_v31  ;;  %v533_v53 = vadd.f32 %v532_v42, %v518_v12  ;;  %v581_v54 = vsub.f32 %v548_v29, %v565_v25 }
  0x63   :  { %v491_v46 = vld [vmem:[#allocation5 + $0x2c0] sm:$0xff]  ;;  %v567_v50 = vld [vmem:[#allocation5 + $0x310] sm:$0xff]  ;;  %v582_v10 = vsub.f32 %v549_v35, %v566_v36  ;;  %v432_v55 = vsub.f32 %v399_v60, %v416_v14  ;;  %v441_v17 = vmul.f32 %v425_v3, %v425_v3  ;;  %v442_v57 = vmul.f32 %v426_v58, %v426_v58  ;;  %v551_v63 = vld [vmem:[#allocation2 + $0x318] sm:$0xff] }
  0x64   :  { %v455_v62 = vadd.f32 %v454_v34, %v440_v59  ;;  %v568_v0 = vld [vmem:[#allocation5 + $0x318] sm:$0xff]  ;;  %v475_v37 = vld [vmem:[#allocation2 + $0x2c8] sm:$0xff]  ;;  %v507_v7 = vsub.f32 %v474_v33, %v491_v46  ;;  %v521_v61 = vmul.f32 %v505_v39, %v505_v39  ;;  %v534_v52 = vadd.f32 %v533_v53, %v519_v40  ;;  %v552_v6 = vld [vmem:[#allocation2 + $0x320] sm:$0xff] }
  0x65   :  { %v492_v1 = vld [vmem:[#allocation5 + $0x2c8] sm:$0xff]  ;;  %v583_v19 = vsub.f32 %v550_v49, %v567_v50  ;;  %v297_v8 = vadd.f32 %v296_v44, %v878_v5  ;;  %v375_v11 = vadd.f32 %v374_v45, %v893_v24  ;;  %v918_v9 = vmul.f32 %v427_v15, %v427_v15  ;;  %v569_v16 = vld [vmem:[#allocation5 + $0x320] sm:$0xff]  ;;  %v476_v5 = vld [vmem:[#allocation2 + $0x2d0] sm:$0xff] }
  0x66   :  { %v522_v13 = vmul.f32 %v506_v48, %v506_v48  ;;  %v535_v3 = vadd.f32 %v534_v52, %v520_v51  ;;  %v584_v58 = vsub.f32 %v551_v63, %v568_v0  ;;  %v597_v18 = vmul.f32 %v581_v54, %v581_v54  ;;  %v553_v29 = vld [vmem:[#allocation2 + $0x328] sm:$0xff]  ;;  %v477_v34 = vld [vmem:[#allocation2 + $0x2d8] sm:$0xff]  ;;  %v493_v24 = vld [vmem:[#allocation5 + $0x2d0] sm:$0xff] }
  0x67   :  { %v598_v21 = vmul.f32 %v582_v10, %v582_v10  ;;  %v920_v22 = vmul.f32 %v428_v20, %v428_v20  ;;  %v922_v31 = vmul.f32 %v429_v27, %v429_v27  ;;  %v456_v12 = vadd.f32 %v455_v62, %v441_v17  ;;  %v570_v59 = vld [vmem:[#allocation5 + $0x328] sm:$0xff]  ;;  %v494_v27 = vld [vmem:[#allocation5 + $0x2d8] sm:$0xff]  ;;  %v554_v39 = vld [vmem:[#allocation2 + $0x330] sm:$0xff] }
  0x68   :  { %v508_v4 = vsub.f32 %v475_v37, %v492_v1  ;;  %v523_v15 = vmul.f32 %v507_v7, %v507_v7  ;;  %v536_v35 = vadd.f32 %v535_v3, %v521_v61  ;;  %v585_v25 = vsub.f32 %v552_v6, %v569_v16  ;;  %v571_v40 = vld [vmem:[#allocation5 + $0x330] sm:$0xff]  ;;  %v478_v42 = vld [vmem:[#allocation2 + $0x2e0] sm:$0xff]  ;;  %v555_v45 = vld [vmem:[#allocation2 + $0x338] sm:$0xff] }
  0x69   :  { %v599_v36 = vmul.f32 %v583_v19, %v583_v19  ;;  %v298_v60 = vadd.f32 %v297_v8, %v881_v23  ;;  %v376_v14 = vadd.f32 %v375_v11, %v895_v26  ;;  %v926_v33 = vmul.f32 %v430_v28, %v430_v28  ;;  %v572_v46 = vld [vmem:[#allocation5 + $0x338] sm:$0xff]  ;;  %v630_v51 = vld [vmem:[#allocation2 + $0x380] sm:$0xff]  ;;  %v631_v28 = vld [vmem:[#allocation2 + $0x388] sm:$0xff] }
  0x6a   :  { %v928_v20 = vmul.f32 %v431_v38, %v431_v38  ;;  %v537_v44 = vadd.f32 %v536_v35, %v522_v13  ;;  %v586_v48 = vsub.f32 %v553_v29, %v570_v59  ;;  %v600_v49 = vmul.f32 %v584_v58, %v584_v58  ;;  %v647_v10 = vld [vmem:[#allocation5 + $0x380] sm:$0xff]  ;;  %v648_v38 = vld [vmem:[#allocation5 + $0x388] sm:$0xff]  ;;  %v632_v8 = vld [vmem:[#allocation2 + $0x390] sm:$0xff] }
  0x6b   :  { %v613_v50 = vadd.f32 %v598_v21, %v597_v18  ;;  %v930_v53 = vmul.f32 %v432_v55, %v432_v55  ;;  %v457_v23 = vadd.f32 %v456_v12, %v442_v57  ;;  %v509_v54 = vsub.f32 %v476_v5, %v493_v24  ;;  %v495_v17 = vld [vmem:[#allocation5 + $0x2e0] sm:$0xff]  ;;  %v479_v55 = vld [vmem:[#allocation2 + $0x2e8] sm:$0xff]  ;;  %v649_v11 = vld [vmem:[#allocation5 + $0x390] sm:$0xff] }
  0x6c   :  { %v524_v26 = vmul.f32 %v508_v4, %v508_v4  ;;  %v538_v62 = vadd.f32 %v537_v44, %v523_v15  ;;  %v556_v63 = vld [vmem:[#allocation2 + $0x340] sm:$0xff]  ;;  %v587_v37 = vsub.f32 %v554_v39, %v571_v40  ;;  %v601_v1 = vmul.f32 %v585_v25, %v585_v25  ;;  %v496_v13 = vld [vmem:[#allocation5 + $0x2e8] sm:$0xff]  ;;  %v633_v59 = vld [vmem:[#allocation2 + $0x398] sm:$0xff] }
  0x6d   :  { %v573_v0 = vld [vmem:[#allocation5 + $0x340] sm:$0xff]  ;;  %v614_v7 = vadd.f32 %v613_v50, %v599_v36  ;;  %v933_v61 = vadd.f32 %v298_v60, %v883_v30  ;;  %v377_v52 = vadd.f32 %v376_v14, %v897_v2  ;;  %v510_v19 = vsub.f32 %v477_v34, %v494_v27  ;;  %v557_v6 = vld [vmem:[#allocation2 + $0x348] sm:$0xff]  ;;  %v650_v5 = vld [vmem:[#allocation5 + $0x398] sm:$0xff] }
  0x6e   :  { %v588_v57 = vsub.f32 %v555_v45, %v572_v46  ;;  %v574_v16 = vld [vmem:[#allocation5 + $0x348] sm:$0xff]  ;;  %v602_v3 = vmul.f32 %v586_v48, %v586_v48  ;;  %v663_v18 = vsub.f32 %v630_v51, %v647_v10  ;;  %v664_v21 = vsub.f32 %v631_v28, %v648_v38  ;;  %v558_v24 = vld [vmem:[#allocation2 + $0x350] sm:$0xff]  ;;  %v634_v39 = vld [vmem:[#allocation2 + $0x3a0] sm:$0xff] }
  0x6f   :  { %v615_v58 = vadd.f32 %v614_v7, %v600_v49  ;;  %v458_v12 = vadd.f32 %v457_v23, %v918_v9  ;;  %v511_v4 = vsub.f32 %v478_v42, %v495_v17  ;;  %v525_v29 = vmul.f32 %v509_v54, %v509_v54  ;;  %v575_v34 = vld [vmem:[#allocation5 + $0x350] sm:$0xff]  ;;  %v651_v40 = vld [vmem:[#allocation5 + $0x3a0] sm:$0xff]  ;;  %v559_v44 = vld [vmem:[#allocation2 + $0x358] sm:$0xff] }
  0x70   :  { %v589_v30 = vsub.f32 %v556_v63, %v573_v0  ;;  %v539_v2 = vadd.f32 %v538_v62, %v524_v26  ;;  %v603_v15 = vmul.f32 %v587_v37, %v587_v37  ;;  %v665_v25 = vsub.f32 %v632_v8, %v649_v11  ;;  %v576_v9 = vld [vmem:[#allocation5 + $0x358] sm:$0xff]  ;;  %v560_v51 = vld [vmem:[#allocation2 + $0x360] sm:$0xff]  ;;  %v635_v26 = vld [vmem:[#allocation2 + $0x3a8] sm:$0xff] }
  0x71   :  { %v616_v35 = vadd.f32 %v615_v58, %v601_v1  ;;  %v378_v36 = vadd.f32 %v377_v52, %v899_v32  ;;  %v512_v60 = vsub.f32 %v479_v55, %v496_v13  ;;  %v590_v14 = vsub.f32 %v557_v6, %v574_v16  ;;  %v652_v28 = vld [vmem:[#allocation5 + $0x3a8] sm:$0xff]  ;;  %v577_v10 = vld [vmem:[#allocation5 + $0x360] sm:$0xff]  ;;  %v636_v17 = vld [vmem:[#allocation2 + $0x3b0] sm:$0xff] }
  0x72   :  { %v604_v27 = vmul.f32 %v588_v57, %v588_v57  ;;  %v666_v45 = vsub.f32 %v633_v59, %v650_v5  ;;  %v679_v46 = vmul.f32 %v663_v18, %v663_v18  ;;  %v680_v48 = vmul.f32 %v664_v21, %v664_v21  ;;  %v653_v62 = vld [vmem:[#allocation5 + $0x3b0] sm:$0xff]  ;;  %v561_v6 = vld [vmem:[#allocation2 + $0x368] sm:$0xff]  ;;  %v637_v58 = vld [vmem:[#allocation2 + $0x3b8] sm:$0xff] }
  0x73   :  { %v617_v42 = vadd.f32 %v616_v35, %v602_v3  ;;  %v459_v49 = vadd.f32 %v458_v12, %v920_v22  ;;  %v526_v50 = vmul.f32 %v510_v19, %v510_v19  ;;  %v591_v23 = vsub.f32 %v558_v24, %v575_v34  ;;  %v480_v55 = vld [vmem:[#allocation2 + $0x2f0] sm:$0xff]  ;;  %v654_v18 = vld [vmem:[#allocation5 + $0x3b8] sm:$0xff] }
  0x74   :  { %v605_v54 = vmul.f32 %v589_v30, %v589_v30  ;;  %v540_v32 = vadd.f32 %v539_v2, %v525_v29  ;;  %v667_v63 = vsub.f32 %v634_v39, %v651_v40  ;;  %v681_v0 = vmul.f32 %v665_v25, %v665_v25  ;;  %v497_v22 = vld [vmem:[#allocation5 + $0x2f0] sm:$0xff]  ;;  %v578_v29 = vld [vmem:[#allocation5 + $0x368] sm:$0xff]  ;;  %v655_v30 = vld [vmem:[#allocation5 + $0x3c0] sm:$0xff] }
  0x75   :  { %v618_v38 = vadd.f32 %v617_v42, %v603_v15  ;;  %v379_v37 = vadd.f32 %v378_v36, %v903_v41  ;;  %v527_v1 = vmul.f32 %v511_v4, %v511_v4  ;;  %v592_v7 = vsub.f32 %v559_v44, %v576_v9  ;;  %v638_v4 = vld [vmem:[#allocation2 + $0x3c0] sm:$0xff]  ;;  %v481_v35 = vld [vmem:[#allocation2 + $0x2f8] sm:$0xff]  ;;  %v562_v40 = vld [vmem:[#allocation2 + $0x370] sm:$0xff] }
  0x76   :  { %v606_v52 = vmul.f32 %v590_v14, %v590_v14  ;;  %v668_v57 = vsub.f32 %v635_v26, %v652_v28  ;;  %v682_v8 = vmul.f32 %v666_v45, %v666_v45  ;;  %v695_v11 = vadd.f32 %v680_v48, %v679_v46  ;;  %v639_v42 = vld [vmem:[#allocation2 + $0x3c8] sm:$0xff] }
  0x77   :  { %v619_v19 = vadd.f32 %v618_v38, %v604_v27  ;;  %v460_v13 = vadd.f32 %v459_v49, %v922_v31  ;;  %v593_v16 = vsub.f32 %v560_v51, %v577_v10  ;;  %v607_v3 = vmul.f32 %v591_v23, %v591_v23  ;;  %v498_v31 = vld [vmem:[#allocation5 + $0x2f8] sm:$0xff]  ;;  %v656_v45 = vld [vmem:[#allocation5 + $0x3c8] sm:$0xff]  ;;  %v579_v49 = vld [vmem:[#allocation5 + $0x370] sm:$0xff] }
  0x78   :  { %v669_v21 = vsub.f32 %v636_v17, %v653_v62  ;;  %v541_v12 = vadd.f32 %v540_v32, %v526_v50  ;;  %v683_v59 = vmul.f32 %v667_v63, %v667_v63  ;;  %v696_v5 = vadd.f32 %v695_v11, %v681_v0  ;;  %v640_v50 = vld [vmem:[#allocation2 + $0x3d0] sm:$0xff]  ;;  %v563_v63 = vld [vmem:[#allocation2 + $0x378] sm:$0xff] }
  0x79   :  { %v620_v41 = vadd.f32 %v619_v19, %v605_v54  ;;  %v380_v2 = vadd.f32 %v379_v37, %v905_v47  ;;  %v513_v24 = vsub.f32 %v480_v55, %v497_v22  ;;  %v528_v34 = vmul.f32 %v512_v60, %v512_v60  ;;  %v657_v60 = vld [vmem:[#allocation5 + $0x3d0] sm:$0xff]  ;;  %v580_v22 = vld [vmem:[#allocation5 + $0x378] sm:$0xff] }
  0x7a   :  { %v608_v15 = vmul.f32 %v592_v7, %v592_v7  ;;  %v670_v36 = vsub.f32 %v637_v58, %v654_v18  ;;  %v684_v14 = vmul.f32 %v668_v57, %v668_v57  ;;  %v697_v27 = vadd.f32 %v696_v5, %v682_v8  ;;  %v658_v7 = vld [vmem:[#allocation5 + $0x3d8] sm:$0xff]  ;;  %v643_v18 = vld [vmem:[#allocation2 + $0x3e8] sm:$0xff] }
  0x7b   :  { %v621_v25 = vadd.f32 %v620_v41, %v606_v52  ;;  %v461_v39 = vadd.f32 %v460_v13, %v926_v33  ;;  %v594_v44 = vsub.f32 %v561_v6, %v578_v29  ;;  %v609_v9 = vmul.f32 %v593_v16, %v593_v16 }
  0x7c   :  { %v671_v46 = vsub.f32 %v638_v4, %v655_v30  ;;  %v542_v48 = vadd.f32 %v541_v12, %v527_v1  ;;  %v685_v51 = vmul.f32 %v669_v21, %v669_v21  ;;  %v698_v23 = vadd.f32 %v697_v27, %v683_v59  ;;  %v641_v1 = vld [vmem:[#allocation2 + $0x3d8] sm:$0xff]  ;;  %v660_v21 = vld [vmem:[#allocation5 + $0x3e8] sm:$0xff]  ;;  %v644_v4 = vld [vmem:[#allocation2 + $0x3f0] sm:$0xff] }
  0x7d   :  { %v622_v47 = vadd.f32 %v621_v25, %v607_v3  ;;  %v300_v54 = vadd.f32 %v933_v61, %v912_v43  ;;  %v381_v26 = vadd.f32 %v380_v2, %v907_v56  ;;  %v514_v28 = vsub.f32 %v481_v35, %v498_v31  ;;  %v642_v43 = vld [vmem:[#allocation2 + $0x3e0] sm:$0xff]  ;;  %v661_v30 = vld [vmem:[#allocation5 + $0x3f0] sm:$0xff]  ;;  %v645_v31 = vld [vmem:[#allocation2 + $0x3f8] sm:$0xff] }
  0x7e   :  { %v529_v33 = vmul.f32 %v513_v24, %v513_v24  ;;  %v672_v10 = vsub.f32 %v639_v42, %v656_v45  ;;  %v686_v38 = vmul.f32 %v670_v36, %v670_v36  ;;  %v699_v17 = vadd.f32 %v698_v23, %v684_v14  ;;  %v659_v61 = vld [vmem:[#allocation5 + $0x3e0] sm:$0xff]  ;;  %v662_v25 = vld [vmem:[#allocation5 + $0x3f8] sm:$0xff] }
  0x7f   :  { %v623_v32 = vadd.f32 %v622_v47, %v608_v15  ;;  %v462_v62 = vadd.f32 %v461_v39, %v928_v20  ;;  %v595_v0 = vsub.f32 %v562_v40, %v579_v49  ;;  %v610_v37 = vmul.f32 %v594_v44, %v594_v44 }
  0x80   :  { %v673_v52 = vsub.f32 %v640_v50, %v657_v60  ;;  %v543_v55 = vadd.f32 %v542_v48, %v528_v34  ;;  %v687_v56 = vmul.f32 %v671_v46, %v671_v46  ;;  %v700_v57 = vadd.f32 %v699_v17, %v685_v51 }
  0x81   :  { %v624_v19 = vadd.f32 %v623_v32, %v609_v9  ;;  %v530_v8 = vmul.f32 %v514_v28, %v514_v28  ;;  %v382_v11 = vadd.f32 %v381_v26, %v300_v54  ;;  %v674_v13 = vsub.f32 %v641_v1, %v658_v7 }
  0x82   :  { %v688_v6 = vmul.f32 %v672_v10, %v672_v10  ;;  %v701_v16 = vadd.f32 %v700_v57, %v686_v38  ;;  %v463_v20 = vadd.f32 %v462_v62, %v930_v53  ;;  %v596_v3 = vsub.f32 %v563_v63, %v580_v22 }
  0x83   :  { %v611_v58 = vmul.f32 %v595_v0, %v595_v0  ;;  %v675_v12 = vsub.f32 %v642_v43, %v659_v61  ;;  %v544_v29 = vadd.f32 %v543_v55, %v529_v33  ;;  %v625_v41 = vadd.f32 %v624_v19, %v610_v37 }
  0x84   :  { %v689_v59 = vmul.f32 %v673_v52, %v673_v52  ;;  %v702_v5 = vadd.f32 %v701_v16, %v687_v56  ;;  %v676_v2 = vsub.f32 %v643_v18, %v660_v21  ;;  %v690_v24 = vmul.f32 %v674_v13, %v674_v13 }
  0x85   :  { %v464_v15 = vadd.f32 %v463_v20, %v382_v11  ;;  %v612_v35 = vmul.f32 %v596_v3, %v596_v3  ;;  %v677_v36 = vsub.f32 %v644_v4, %v661_v30  ;;  %v545_v53 = vadd.f32 %v544_v29, %v530_v8 }
  0x86   :  { %v703_v34 = vadd.f32 %v702_v5, %v688_v6  ;;  %v626_v14 = vadd.f32 %v625_v41, %v611_v58  ;;  %v691_v27 = vmul.f32 %v675_v12, %v675_v12  ;;  %v678_v40 = vsub.f32 %v645_v31, %v662_v25 }
  0x87   :  { %v692_v44 = vmul.f32 %v676_v2, %v676_v2  ;;  %v546_v42 = vadd.f32 %v545_v53, %v464_v15  ;;  %v693_v46 = vmul.f32 %v677_v36, %v677_v36 }
  0x88   :  { %v704_v39 = vadd.f32 %v703_v34, %v689_v59  ;;  %v627_v45 = vadd.f32 %v626_v14, %v612_v35  ;;  %v694_v49 = vmul.f32 %v678_v40, %v678_v40 }
  0x8a   :  { %v705_v9 = vadd.f32 %v704_v39, %v690_v24  ;;  %v628_v50 = vadd.f32 %v627_v45, %v546_v42 }
  0x8c   :  { %v706_v48 = vadd.f32 %v705_v9, %v691_v27 }
  0x8e   :  { %v707_v47 = vadd.f32 %v706_v48, %v692_v44 }
  0x90   :  { %v708_v60 = vadd.f32 %v707_v47, %v693_v46 }
  0x92   :  { %v709_v51 = vadd.f32 %v708_v60, %v694_v49 }
  0x94   :  { %v710_v23 = vadd.f32 %v709_v51, %v628_v50 }
  0x96   :  { %713 = vst [vmem:[#allocation7] sm:$0xff] %v710_v23 }
  0x97   :  { %791 = shalt.err (!%p788_p6)
}
  0x98   :  { %s792_s10 = scalar_lea.hbm %s962_s2, 128 }
  0x99   :  { %p793_p7 = scmp.ne.s32.totalorder %s962_s2, %s792_s10  ;;  %p796_p8 = scmp.lt.u32.totalorder %s792_s10, %s962_s2 }
  0x9b   :  { %p798_p9 = pnand %p796_p8, %p793_p7 }
  0x9d   :  { %801 = shalt.err (!%p798_p9)
}
  0x9e   :  { %723 = dma.vmem_to_hbm [thread:$0]  %s721_s6, 128, %s962_s2, [#allocation4]  }
  0x9f   :  { %806 = dma.done.wait [#allocation4], 128  }
  0xa0   :  { %807 = vsyncadd [#allocation4], 4294967168 }
  0xa1   :  { %727 = vsyncpa [#allocation3], 1 }
  0xa2   :  { %728 = vsyncpa [#allocation6], 1 }
  0xa3   :  { %729 = vsyncpa [#allocation4], 1 }

</bundles_post_ra>
